<compile_context>
chip_gen: v7x
topology: tpu7x:2x2x1
jax: 0.10.0
libtpu: 0.0.40
codegen_flags: <defaults>
</compile_context>

<pallas_src>
import jax
import jax.numpy as jnp
from jax.experimental import pallas as pl
from jax.experimental.pallas import tpu as pltpu

_LANE = 128


def _round_up(x, m):
    return ((x + m - 1) // m) * m


# ----------------------------------------------------------------------------
# Per-generation tuning (VMEM scoped limit, default matmul row tile).
# ----------------------------------------------------------------------------
_TPU_PARAMS = {}


def _tpu_params():
    if _TPU_PARAMS:
        return _TPU_PARAMS
    cap = None
    try:
        info = pltpu.get_tpu_info()
        for name in ("vmem_capacity_bytes", "vmem_size_bytes", "vmem_bytes"):
            v = getattr(info, name, None)
            if v:
                cap = int(v)
                break
    except Exception:
        cap = None
    if not cap or cap <= 0:
        cap = 64 * 1024 * 1024                 # conservative: assume v7x VMEM
    if cap >= 96 * 1024 * 1024:                # v5e / v6e (128 MiB per core)
        _TPU_PARAMS.update(vmem_limit=64 * 1024 * 1024, tile_m=1024)
    else:                                      # v7x (64 MiB per core)
        _TPU_PARAMS.update(vmem_limit=48 * 1024 * 1024, tile_m=512)
    return _TPU_PARAMS


# ----------------------------------------------------------------------------
# Kernel 1: row-tiled fused matmul + folded-BN shift [+ residual] [+ ReLU].
# Used for 1x1 convolutions, the im2col'd stem, and the BN1d + Linear head.
# ----------------------------------------------------------------------------
def _matmul_kernel(relu, has_res):
    def kernel(*refs):
        if has_res:
            x_ref, w_ref, b_ref, r_ref, o_ref = refs
        else:
            x_ref, w_ref, b_ref, o_ref = refs
            r_ref = None
        acc = jnp.dot(x_ref[...], w_ref[...], preferred_element_type=jnp.float32)
        acc = acc + b_ref[...]
        if has_res:
            acc = acc + r_ref[...].astype(jnp.float32)
        if relu:
            acc = jnp.maximum(acc, 0.0)
        o_ref[...] = acc.astype(o_ref.dtype)
    return kernel


def _fused_matmul(x2d, w2d, bias2d, residual2d=None, *, relu, out_dtype,
                  tile_m=None):
    """act(x2d @ w2d + bias2d [+ residual2d]).

    x2d/w2d bf16, bias f32, w2d's N a multiple of 128 (lane-dense stores).
    M is tiled with a partial tail block (no wrapper-side pad through HBM);
    wide N (> 1024) gets its own 'parallel' grid axis so the resident weight
    block stays small on 64-MiB-VMEM parts.
    """
    M, K = x2d.shape
    Kw, Np = w2d.shape
    assert Kw == K and Np % _LANE == 0
    params = _tpu_params()
    if tile_m is None:
        tile_m = params["tile_m"]
    if M <= 8:
        tile_m = M
    else:
        tile_m = _round_up(min(tile_m, M), 8)
    tile_n = 512 if (Np > 1024 and Np % 512 == 0) else Np
    grid = (pl.cdiv(M, tile_m), Np // tile_n)

    in_specs = [
        pl.BlockSpec((tile_m, K), lambda i, j: (i, 0)),    # resident across j
        pl.BlockSpec((K, tile_n), lambda i, j: (0, j)),
        pl.BlockSpec((1, tile_n), lambda i, j: (0, j)),
    ]
    args = [x2d, w2d, bias2d]
    if residual2d is not None:
        in_specs.append(pl.BlockSpec((tile_m, tile_n), lambda i, j: (i, j)))
        args.append(residual2d)

    return pl.pallas_call(
        _matmul_kernel(relu, residual2d is not None),
        out_shape=jax.ShapeDtypeStruct((M, Np), out_dtype),
        grid_spec=pltpu.PrefetchScalarGridSpec(
            num_scalar_prefetch=0,
            grid=grid,
            in_specs=in_specs,
            out_specs=pl.BlockSpec((tile_m, tile_n), lambda i, j: (i, j)),
        ),
        compiler_params=pltpu.CompilerParams(
            dimension_semantics=("parallel", "parallel"),
            vmem_limit_bytes=params["vmem_limit"]),
    )(*args)


# ----------------------------------------------------------------------------
# Kernel 2: kxk conv (C1 >= 32), space-to-depth input, tap loop in-kernel,
# one output row band per grid step, band accumulated locally (no scratch).
# ----------------------------------------------------------------------------
def _make_conv_band_kernel(kh, kw, stride, tile_h, Wo, Hq, relu):
    def kernel(x_ref, w_ref, shift_ref, out_ref):
        # x_ref:     (1, s*s*Hq, Wq, C1x) bf16  space-to-depth padded image
        # w_ref:     (kh*kw, C1x, C2p)    bf16  BN-scale-folded conv weights
        # shift_ref: (1, C2p)             f32   folded BN shift
        # out_ref:   (1, tile_h, Wo, C2p)       one output row band
        h0 = pl.program_id(1) * tile_h
        c1 = x_ref.shape[-1]
        acc = None
        t = 0
        for ki in range(kh):
            qi, ri = ki // stride, ki % stride
            for kj in range(kw):
                qj, rj = kj // stride, kj % stride
                base = (ri * stride + rj) * Hq + qi
                xt = x_ref[0, pl.ds(base + h0, tile_h), qj:qj + Wo, :]
                # NOTE: the (tile_h, Wo, C1) -> (tile_h*Wo, C1) reshape is a
                # small C1-wide bf16 relayout when Wo != Wq; cheaper than the
                # full-width-matmul + output sublane-slice alternative.
                part = jnp.dot(xt.reshape(tile_h * Wo, c1), w_ref[t],
                               preferred_element_type=jnp.float32)
                acc = part if acc is None else acc + part
                t += 1
        y = acc + shift_ref[...]
        if relu:
            y = jnp.maximum(y, 0.0)
        out_ref[0] = y.reshape(tile_h, Wo, -1).astype(out_ref.dtype)
    return kernel


def _pick_tile_h(Ho, Wo, C2p):
    # Keep the per-band f32 accumulator around <= ~128 KiB (~32 vregs) so the
    # tap accumulation stays register/near-register resident.
    target_rows = max(Wo, (128 * 1024) // (4 * C2p))
    tile_h = 1
    for t in range(1, Ho + 1):
        if Ho % t == 0 and t * Wo <= target_rows:
            tile_h = t
    return tile_h


# ----------------------------------------------------------------------------
# NHWC inner entry point (chainable; padded channels, no transposes).
# ----------------------------------------------------------------------------
def conv_bn_act_nhwc(x_nhwc, weight, gamma, beta, running_mean, running_var, *,
                     stride=1, padding=0, relu=True, residual_nhwc=None,
                     eps=1e-5, out_dtype=jnp.bfloat16):
    """Conv2d(bias=False) -> BN2d(eval) [-> +residual] [-> ReLU].  NHWC in/out.

    The input may carry extra (zero) channels beyond the conv's in-channels;
    the output carries C2 rounded up to 128 channels (extra channels exactly
    zero), so layers can be chained in this padded NHWC bf16 layout with no
    transposes / pads / un-pads between them.
    """
    N, H, W, C1x = x_nhwc.shape
    C2, C1, kh, kw = weight.shape
    assert C1x >= C1
    s, p = stride, padding
    Ho = (H + 2 * p - kh) // s + 1
    Wo = (W + 2 * p - kw) // s + 1
    params = _tpu_params()

    # Fold eval-mode BN into the conv: scale into the weights, shift -> epilogue.
    scale = gamma / jnp.sqrt(running_var + eps)
    shift = beta - running_mean * scale
    wf = weight * scale[:, None, None, None]

    C2p = _round_up(C2, _LANE)
    shift2d = jnp.pad(shift, (0, C2p - C2)).reshape(1, C2p).astype(jnp.float32)
    x = x_nhwc.astype(jnp.bfloat16)

    res2d = None
    if residual_nhwc is not None:
        r = residual_nhwc
        assert r.shape[:3] == (N, Ho, Wo) and r.shape[-1] in (C2, C2p)
        if r.shape[-1] != C2p:
            r = jnp.pad(r, ((0, 0), (0, 0), (0, 0), (0, C2p - r.shape[-1])))
        res2d = r.reshape(N * Ho * Wo, C2p)

    if kh == 1 and kw == 1 and p == 0:
        # 1x1 conv: (strided subsample +) row-tiled MXU matmul, no im2col.
        xs = x[:, ::s, ::s, :] if s > 1 else x
        x2d = xs.reshape(N * Ho * Wo, C1x)
        w2d = jnp.pad(jnp.transpose(wf[:, :, 0, 0]),
                      ((0, C1x - C1), (0, C2p - C2))).astype(jnp.bfloat16)
        out2d = _fused_matmul(x2d, w2d, shift2d, res2d, relu=relu,
                              out_dtype=out_dtype)
        return out2d.reshape(N, Ho, Wo, C2p)

    if C1 < 32:
        # Few-channel kxk conv (the 4/1-channel 7x7 stem): im2col + matmul, so
        # the MXU contraction is K = kh*kw*C1 instead of a 4-lane tap loop.
        xs = x[..., :C1] if C1x > C1 else x
        xp = jnp.pad(xs, ((0, 0), (p, p), (p, p), (0, 0)))
        cols = []
        for ki in range(kh):
            for kj in range(kw):
                cols.append(jax.lax.slice(
                    xp, (0, ki, kj, 0),
                    (N, ki + (Ho - 1) * s + 1, kj + (Wo - 1) * s + 1, C1),
                    (1, s, s, 1)))
        K = kh * kw * C1
        Kp = _round_up(K, 8)
        patches = jnp.concatenate(cols, axis=-1).reshape(N * Ho * Wo, K)
        if Kp != K:
            patches = jnp.pad(patches, ((0, 0), (0, Kp - K)))
        wmat = jnp.transpose(wf, (2, 3, 1, 0)).reshape(K, C2)
        wmat = jnp.pad(wmat, ((0, Kp - K), (0, C2p - C2))).astype(jnp.bfloat16)
        out2d = _fused_matmul(patches, wmat, shift2d, res2d, relu=relu,
                              out_dtype=out_dtype)
        return out2d.reshape(N, Ho, Wo, C2p)

    # kxk conv, C1 >= 32: single space-to-depth pass over the padded image
    # (~1x HBM volume), tap loop in-kernel, banded output.
    assert res2d is None, "fused residual only on the 1x1 / im2col paths"
    Hq = max(Ho + (kh - 1) // s, -(-(H + 2 * p) // s))
    Wq = max(Wo + (kw - 1) // s, -(-(W + 2 * p) // s))
    pad_b, pad_r = Hq * s - H - p, Wq * s - W - p
    assert pad_b >= p and pad_r >= p, "insufficient bottom/right padding"
    xp = jnp.pad(x, ((0, 0), (p, pad_b), (p, pad_r), (0, 0)))
    xsd = jnp.transpose(xp.reshape(N, Hq, s, Wq, s, C1x), (0, 2, 4, 1, 3, 5))
    xsd = xsd.reshape(N, s * s * Hq, Wq, C1x)
    w3 = jnp.transpose(wf, (2, 3, 1, 0)).reshape(kh * kw, C1, C2)
    w3 = jnp.pad(w3, ((0, 0), (0, C1x - C1), (0, C2p - C2))).astype(jnp.bfloat16)

    tile_h = _pick_tile_h(Ho, Wo, C2p)
    kernel = _make_conv_band_kernel(kh, kw, s, tile_h, Wo, Hq, relu)
    return pl.pallas_call(
        kernel,
        out_shape=jax.ShapeDtypeStruct((N, Ho, Wo, C2p), out_dtype),
        grid_spec=pltpu.PrefetchScalarGridSpec(
            num_scalar_prefetch=0,
            grid=(N, Ho // tile_h),
            in_specs=[
                pl.BlockSpec((1, s * s * Hq, Wq, C1x),
                             lambda n, b: (n, 0, 0, 0)),   # resident across b
                pl.BlockSpec((kh * kw, C1x, C2p), lambda n, b: (0, 0, 0)),
                pl.BlockSpec((1, C2p), lambda n, b: (0, 0)),
            ],
            out_specs=pl.BlockSpec((1, tile_h, Wo, C2p),
                                   lambda n, b: (n, b, 0, 0)),
        ),
        compiler_params=pltpu.CompilerParams(
            dimension_semantics=("parallel", "parallel"),
            vmem_limit_bytes=params["vmem_limit"]),
    )(xsd, w3, shift2d)


# ----------------------------------------------------------------------------
# Public wrappers matching the PyTorch module's NCHW layout.
# ----------------------------------------------------------------------------
def conv_bn_relu(x_nchw, weight, gamma, beta, running_mean, running_var, *,
                 stride=1, padding=0, eps=1e-5, relu=True, residual=None,
                 out_dtype=jnp.bfloat16):
    """Conv2d(bias=False) -> BN2d(eval) [-> +residual] [-> ReLU].  NCHW in/out.

    `residual` (NCHW, output-shaped) gives the fused bottleneck tail
    relu(conv_bn(x) + shortcut).  For full-network composition, prefer
    conv_bn_act_nhwc to avoid per-layer NCHW<->NHWC transposes.
    """
    C2 = weight.shape[0]
    x_nhwc = jnp.transpose(x_nchw, (0, 2, 3, 1)).astype(jnp.bfloat16)
    res_nhwc = None
    if residual is not None:
        res_nhwc = jnp.transpose(residual, (0, 2, 3, 1))
    out = conv_bn_act_nhwc(x_nhwc, weight, gamma, beta, running_mean,
                           running_var, stride=stride, padding=padding,
                           relu=relu, residual_nhwc=res_nhwc, eps=eps,
                           out_dtype=out_dtype)
    return jnp.transpose(out[..., :C2], (0, 3, 1, 2))


def bn1d_linear(x, gamma, beta, running_mean, running_var, lin_w, lin_b, *,
                eps=1e-5):
    """BatchNorm1d (eval) -> Linear, i.e. `self.l(self.bn(features))`."""
    nc = lin_w.shape[0]
    scale = gamma / jnp.sqrt(running_var + eps)
    shift = beta - running_mean * scale
    w_folded = jnp.transpose(lin_w) * scale[:, None]        # (F, nc)
    b_folded = lin_w @ shift + lin_b                        # (nc,)
    ncp = _round_up(nc, _LANE)
    w2d = jnp.pad(w_folded, ((0, 0), (0, ncp - nc))).astype(jnp.bfloat16)
    b2d = jnp.pad(b_folded, (0, ncp - nc)).reshape(1, ncp).astype(jnp.float32)
    out = _fused_matmul(x.astype(jnp.bfloat16), w2d, b2d, relu=False,
                        out_dtype=jnp.float32)
    return out[:, :nc]


# TODO(synk): the full torchvision ResNet-50 backbone (bottleneck stack,
# 3x3/s2 maxpool, global avg-pool, pretrained weights) is a composition of the
# conv_bn_act_nhwc blocks above (chained in padded NHWC bf16) and is not
# reproduced here.
# TODO(synk): training-mode BatchNorm (batch statistics + running-stat
# updates) is not implemented; eval-mode semantics are used.
# TODO(synk): grid-invariant weight/shift blocks still use the default double
# buffering; pipeline_mode=pl.Buffered(1) would reclaim that VMEM on v7x.


# ----------------------------------------------------------------------------
# References (same bf16-cast folded weights/inputs so only accumulation order
# and the final bf16 store differ).
# ----------------------------------------------------------------------------
def _ref_conv_bn(x, weight, gamma, beta, mean, var, *, stride, padding,
                 relu=True, residual=None, eps=1e-5):
    scale = gamma / jnp.sqrt(var + eps)
    shift = beta - mean * scale
    wf = (weight * scale[:, None, None, None]).astype(jnp.bfloat16).astype(jnp.float32)
    xb = x.astype(jnp.bfloat16).astype(jnp.float32)
    y = jax.lax.conv_general_dilated(
        xb, wf, (stride, stride),
        [(padding, padding), (padding, padding)],
        dimension_numbers=("NCHW", "OIHW", "NCHW"))
    y = y + shift.reshape(1, -1, 1, 1)
    if residual is not None:
        y = y + residual
    if relu:
        y = jnp.maximum(y, 0.0)
    return y


def _ref_bn1d_linear(x, gamma, beta, mean, var, lin_w, lin_b, eps=1e-5):
    scale = gamma / jnp.sqrt(var + eps)
    shift = beta - mean * scale
    w_folded = (jnp.transpose(lin_w) * scale[:, None]).astype(jnp.bfloat16).astype(jnp.float32)
    b_folded = lin_w @ shift + lin_b
    xb = x.astype(jnp.bfloat16).astype(jnp.float32)
    return xb @ w_folded + b_folded


if __name__ == "__main__":
    key = jax.random.PRNGKey(0)
    ks = jax.random.split(key, 20)
    N = 2

    def bn_params(k, c):
        k1, k2, k3, k4 = jax.random.split(k, 4)
        gamma = jax.random.uniform(k1, (c,), jnp.float32, 0.5, 1.5)
        beta = jax.random.normal(k2, (c,), jnp.float32) * 0.1
        mean = jax.random.normal(k3, (c,), jnp.float32) * 0.1
        var = jax.random.uniform(k4, (c,), jnp.float32, 0.5, 1.5)
        return gamma, beta, mean, var

    def check(y, r, name):
        assert jnp.allclose(y.astype(jnp.float32), r.astype(jnp.float32),
                            atol=2e-2, rtol=2e-2), name

    # 1) Modified stem: Conv2d(4, 64, k=7, s=2, p=3) + BN + ReLU (im2col path).
    x = jax.random.normal(ks[0], (N, 4, 16, 16), jnp.float32)
    w_stem = jax.random.normal(ks[1], (64, 4, 7, 7), jnp.float32) * 0.1
    bn_stem = bn_params(ks[2], 64)
    y = jax.block_until_ready(conv_bn_relu(x, w_stem, *bn_stem, stride=2, padding=3))
    r = _ref_conv_bn(x, w_stem, *bn_stem, stride=2, padding=3)
    assert y.shape == (N, 64, 8, 8)
    check(y, r, "stem 7x7 im2col")

    # 2) Bottleneck 3x3 conv (s=1, p=1, C1=32): banded space-to-depth kernel,
    #    multiple row bands per image.
    x3 = jax.random.normal(ks[3], (N, 32, 32, 32), jnp.float32)
    w3 = jax.random.normal(ks[4], (32, 32, 3, 3), jnp.float32) * 0.05
    bn3 = bn_params(ks[5], 32)
    y = jax.block_until_ready(conv_bn_relu(x3, w3, *bn3, stride=1, padding=1))
    r = _ref_conv_bn(x3, w3, *bn3, stride=1, padding=1)
    assert y.shape == (N, 32, 32, 32)
    check(y, r, "3x3 s1 banded")

    # 3) Strided 3x3 conv (s=2, p=1): space-to-depth with stride phases.
    x3s = jax.random.normal(ks[6], (N, 32, 16, 16), jnp.float32)
    w3s = jax.random.normal(ks[7], (48, 32, 3, 3), jnp.float32) * 0.05
    bn3s = bn_params(ks[8], 48)
    y = jax.block_until_ready(conv_bn_relu(x3s, w3s, *bn3s, stride=2, padding=1))
    r = _ref_conv_bn(x3s, w3s, *bn3s, stride=2, padding=1)
    assert y.shape == (N, 48, 8, 8)
    check(y, r, "3x3 s2 banded")

    # 4) Bottleneck 1x1 convs: (a) Conv+BN with NO ReLU (downsample shortcut),
    #    (b) fused relu(conv_bn(x) + residual) bottleneck tail.
    x1 = jax.random.normal(ks[9], (N, 32, 8, 8), jnp.float32)
    w1 = jax.random.normal(ks[10], (64, 32, 1, 1), jnp.float32) * 0.1
    bn1 = bn_params(ks[11], 64)
    y = jax.block_until_ready(
        conv_bn_relu(x1, w1, *bn1, stride=1, padding=0, relu=False))
    r = _ref_conv_bn(x1, w1, *bn1, stride=1, padding=0, relu=False)
    assert y.shape == (N, 64, 8, 8)
    check(y, r, "1x1 no-relu")

    res = jax.random.normal(ks[12], (N, 64, 8, 8), jnp.float32)
    y = jax.block_until_ready(
        conv_bn_relu(x1, w1, *bn1, stride=1, padding=0, relu=True, residual=res))
    r = _ref_conv_bn(x1, w1, *bn1, stride=1, padding=0, relu=True, residual=res)
    check(y, r, "1x1 fused residual+relu")

    # 5) Head: BatchNorm1d(F) + Linear(F, nc)  ==  self.l(self.bn(features))
    F, nc = 32, 10
    xh = jax.random.normal(ks[13], (N, F), jnp.float32)
    bnh = bn_params(ks[14], F)
    lw = jax.random.normal(ks[15], (nc, F), jnp.float32) * 0.1
    lb = jax.random.normal(ks[16], (nc,), jnp.float32) * 0.1
    yh = jax.block_until_ready(bn1d_linear(xh, *bnh, lw, lb))
    rh = _ref_bn1d_linear(xh, *bnh, lw, lb)
    assert yh.shape == (N, nc)
    check(yh, rh, "bn1d+linear head")

    print("KERNEL_OK")
</pallas_src>

<mosaic_0001>
module attributes {stable_mosaic.version = 11 : i64} {
  func.func @kernel(%arg0: i32, %arg1: i32, %arg2: memref<128x200xbf16, #tpu.memory_space<vmem>>, %arg3: memref<200x128xbf16, #tpu.memory_space<vmem>>, %arg4: memref<1x128xf32, #tpu.memory_space<vmem>>, %arg5: memref<128x128xbf16, #tpu.memory_space<vmem>>) attributes {dimension_semantics = [#tpu.dimension_semantics<parallel>, #tpu.dimension_semantics<parallel>], iteration_bounds = array<i64: 1, 1>, scalar_prefetch = 0 : i64, scratch_operands = 0 : i64, tpu.core_type = #tpu.core_type<tc>, window_params = [{transform_indices = @transform_0, window_bounds = array<i64: 128, 200>}, {transform_indices = @transform_1, window_bounds = array<i64: 200, 128>}, {transform_indices = @transform_2, window_bounds = array<i64: 1, 128>}, {transform_indices = @transform_3, window_bounds = array<i64: 128, 128>}]} {
    %c0 = arith.constant 0 : index
    %c0_0 = arith.constant 0 : index
    %0 = vector.load %arg2[%c0, %c0_0] : memref<128x200xbf16, #tpu.memory_space<vmem>>, vector<128x200xbf16>
    %c0_1 = arith.constant 0 : index
    %c0_2 = arith.constant 0 : index
    %1 = vector.load %arg3[%c0_1, %c0_2] : memref<200x128xbf16, #tpu.memory_space<vmem>>, vector<200x128xbf16>
    %cst = arith.constant dense<0.000000e+00> : vector<128x128xf32>
    %2 = tpu.matmul %0, %1, %cst {dimension_numbers = #tpu.dot_dimension_numbers<[1], [0], [0], [1], [0, 0, 1, 1], [], []>} : vector<128x200xbf16>, vector<200x128xbf16>, vector<128x128xf32> -> vector<128x128xf32>
    %c0_3 = arith.constant 0 : index
    %c0_4 = arith.constant 0 : index
    %3 = vector.load %arg4[%c0_3, %c0_4] : memref<1x128xf32, #tpu.memory_space<vmem>>, vector<1x128xf32>
    %4 = vector.broadcast %3 : vector<1x128xf32> to vector<128x128xf32>
    %5 = arith.addf %2, %4 : vector<128x128xf32>
    %cst_5 = arith.constant 0.000000e+00 : f32
    %6 = vector.broadcast %cst_5 : f32 to vector<128x128xf32>
    %7 = arith.maximumf %5, %6 : vector<128x128xf32>
    %8 = arith.truncf %7 : vector<128x128xf32> to vector<128x128xbf16>
    %c0_6 = arith.constant 0 : index
    %c0_7 = arith.constant 0 : index
    %9 = vector.load %arg5[%c0_6, %c0_7] : memref<128x128xbf16, #tpu.memory_space<vmem>>, vector<128x128xbf16>
    tpu.vector_store %arg5[%c0_6, %c0_7], %8 {strides = array<i32>} : memref<128x128xbf16, #tpu.memory_space<vmem>>, vector<128x128xbf16>,
    return
  }
  func.func @transform_0(%arg0: i32, %arg1: i32) -> (i32, i32) {
    %c0_i32 = arith.constant 0 : i32
    %c0_i32_0 = arith.constant 0 : i32
    return %arg0, %c0_i32 : i32, i32
  }
  func.func @transform_1(%arg0: i32, %arg1: i32) -> (i32, i32) {
    %c0_i32 = arith.constant 0 : i32
    %c0_i32_0 = arith.constant 0 : i32
    return %c0_i32, %arg1 : i32, i32
  }
  func.func @transform_2(%arg0: i32, %arg1: i32) -> (i32, i32) {
    %c0_i32 = arith.constant 0 : i32
    %c0_i32_0 = arith.constant 0 : i32
    return %c0_i32, %arg1 : i32, i32
  }
  func.func @transform_3(%arg0: i32, %arg1: i32) -> (i32, i32) {
    %c0_i32 = arith.constant 0 : i32
    return %arg0, %arg1 : i32, i32
  }
}

</mosaic_0001>

<bundles_post_ra>
// kernel: tpu_custom_call.1
= control target key start
LH: loop header
LB: loop body
LE: loop exit
PB: predicated region body
PF: predicated region fallthrough
CT: control target
= control target key end

     0   :  { %v657_v1 = vmov 0   ;;  %vm211_vm0 = vcmask 588800   ;;  %s835_s0 = inlined_call_operand.vmem [shape: bf16[128,200], index: 0, kind: input, shape index: {}]   ;;  %s836_s1 = inlined_call_operand.vmem [shape: bf16[200,128], index: 1, kind: input, shape index: {}]   ;;  %s837_s2 = inlined_call_operand.vmem [shape: f32[1,128], index: 2, kind: input, shape index: {}]   ;;  %s838_s3 = inlined_call_operand.hbm [shape: bf16[128,128], index: 3, kind: output, shape index: {}]  }
   0x1   :  { %v596_v0 = vld [vmem:[%s836_s1] sm:$0xff]   ;;  %240 = vmatprep.subr.bf16.mxu0 %v657_v1  ;;  %566 = vmatprep.subr.bf16.mxu1 %v657_v1  ;;  %v597_v2 = vld [vmem:[%s836_s1 + $0x8] sm:$0xff]   ;;  %v598_v3 = vld [vmem:[%s836_s1 + $0x10] sm:$0xff]  }
   0x2   :  { %241 = vmatpush1.bf16.msra.mxu0 %v596_v0  ;;  %579 = vmatpush1.bf16.msra.mxu1 %v596_v0  ;;  %v599_v4 = vld [vmem:[%s836_s1 + $0x18] sm:$0xff]   ;;  %v611_v5 = vld [vmem:[%s835_s0 + $0x4] ss:$8 sps:$4 sm:$0xff]   ;;  %v602_v9 = vld [vmem:[%s836_s1 + $0x30] sm:$0xff]  }
   0x3   :  { %242 = vmatprep.subr.bf16.mxu0 %v657_v1  ;;  %567 = vmatprep.subr.bf16.mxu1 %v657_v1  ;;  %v600_v6 = vld [vmem:[%s836_s1 + $0x20] sm:$0xff]   ;;  %v601_v8 = vld [vmem:[%s836_s1 + $0x28] sm:$0xff]  }
   0x4   :  { %v614_v7 = vld [vmem:[%s835_s0 + $0x44] ss:$8 sps:$4 sm:$0xff]   ;;  %479 = vmatprep.mubr.msk.bf16.mxu0 %vm211_vm0, %v611_v5 }
   0x5   :  { %483 = vmatprep.mubr.msk.bf16.mxu1 %vm211_vm0, %v614_v7 }
   0x6   :  { %243 = vmatpush1.bf16.msra.mxu0 %v597_v2  ;;  %580 = vmatpush1.bf16.msra.mxu1 %v597_v2 }
   0x7   :  { %244 = vmatprep.subr.bf16.mxu0 %v657_v1  ;;  %568 = vmatprep.subr.bf16.mxu1 %v657_v1 }
   0xa   :  { %245 = vmatpush1.bf16.msra.mxu0 %v598_v3  ;;  %581 = vmatpush1.bf16.msra.mxu1 %v598_v3 }
   0xb   :  { %246 = vmatprep.subr.bf16.mxu0 %v657_v1  ;;  %569 = vmatprep.subr.bf16.mxu1 %v657_v1 }
   0xe   :  { %247 = vmatpush1.bf16.msra.mxu0 %v599_v4  ;;  %582 = vmatpush1.bf16.msra.mxu1 %v599_v4 }
   0xf   :  { %248 = vmatprep.subr.bf16.mxu0 %v657_v1  ;;  %570 = vmatprep.subr.bf16.mxu1 %v657_v1 }
  0x12   :  { %249 = vmatpush1.bf16.msra.mxu0 %v600_v6  ;;  %583 = vmatpush1.bf16.msra.mxu1 %v600_v6 }
  0x13   :  { %250 = vmatprep.subr.bf16.mxu0 %v657_v1  ;;  %571 = vmatprep.subr.bf16.mxu1 %v657_v1 }
  0x16   :  { %251 = vmatpush1.bf16.msra.mxu0 %v601_v8  ;;  %584 = vmatpush1.bf16.msra.mxu1 %v601_v8 }
  0x17   :  { %252 = vmatprep.subr.bf16.mxu0 %v657_v1  ;;  %572 = vmatprep.subr.bf16.mxu1 %v657_v1 }
  0x18   :  { %8 = vsyncpa [#allocation3], 0  ;;  %v603_v10 = vld [vmem:[%s836_s1 + $0x38] sm:$0xff]   ;;  %v604_v11 = vld [vmem:[%s836_s1 + $0x40] sm:$0xff]   ;;  %vm236_vm1 = vcmask 1043456  }
  0x19   :  { %v605_v12 = vld [vmem:[%s836_s1 + $0x48] sm:$0xff]   ;;  %v606_v13 = vld [vmem:[%s836_s1 + $0x50] sm:$0xff]   ;;  %v607_v14 = vld [vmem:[%s836_s1 + $0x58] sm:$0xff]  }
  0x1a   :  { %253 = vmatpush1.bf16.msra.mxu0 %v602_v9  ;;  %585 = vmatpush1.bf16.msra.mxu1 %v602_v9  ;;  %v608_v15 = vld [vmem:[%s836_s1 + $0x60] ss:$0 sps:$4 sm:$0xff]   ;;  %v615_v19 = vld [vmem:[%s835_s0 + $0x14] ss:$8 sps:$4 sm:$0xff]   ;;  %v619_v21 = vld [vmem:[%s835_s0 + $0x10] ss:$8 sps:$4 sm:$0xff]  }
  0x1b   :  { %254 = vmatprep.subr.bf16.mxu0 %v657_v1  ;;  %573 = vmatprep.subr.bf16.mxu1 %v657_v1  ;;  %v238_v16 = vsel %vm236_vm1, %v608_v15, 0  ;;  %v609_v17 = vld [vmem:[%s835_s0] ss:$8 sps:$4 sm:$0xff]   ;;  %v617_v20 = vld [vmem:[%s835_s0 + $0x54] ss:$8 sps:$4 sm:$0xff]  }
  0x1c   :  { %v612_v18 = vld [vmem:[%s835_s0 + $0x40] ss:$8 sps:$4 sm:$0xff]   ;;  %v620_v22 = vld [vmem:[%s835_s0 + $0x50] ss:$8 sps:$4 sm:$0xff]   ;;  %v621_v23 = vld [vmem:[%s835_s0 + $0x24] ss:$8 sps:$4 sm:$0xff]  }
  0x1d   :  { %v623_v24 = vld [vmem:[%s835_s0 + $0x64] ss:$8 sps:$4 sm:$0xff]   ;;  %v625_v25 = vld [vmem:[%s835_s0 + $0x20] ss:$8 sps:$4 sm:$0xff]   ;;  %v627_v27 = vld [vmem:[%s835_s0 + $0x34] ss:$8 sps:$4 sm:$0xff]  }
  0x1e   :  { %255 = vmatpush1.bf16.msra.mxu0 %v603_v10  ;;  %586 = vmatpush1.bf16.msra.mxu1 %v603_v10  ;;  %v626_v26 = vld [vmem:[%s835_s0 + $0x60] ss:$8 sps:$4 sm:$0xff]   ;;  %v629_v28 = vld [vmem:[%s835_s0 + $0x74] ss:$8 sps:$4 sm:$0xff]   ;;  %v631_v29 = vld [vmem:[%s835_s0 + $0x30] ss:$8 sps:$4 sm:$0xff]  }
  0x1f   :  { %256 = vmatprep.subr.bf16.mxu0 %v657_v1  ;;  %574 = vmatprep.subr.bf16.mxu1 %v657_v1  ;;  %v632_v30 = vld [vmem:[%s835_s0 + $0x70] ss:$8 sps:$4 sm:$0xff]   ;;  %v805_v31 = vld [vmem:[%s837_s2] ss:$0 sm:$0xff]  ;;  %s658_s0 = smov [#allocation2]  }
  0x20   :  { %s438_s2 = sshll.u32 %s658_s0, 4  ;;  %s439_s2 = int_to_ptr.vmem [resolvable:$true] %s438_s2 }
  0x21   :  { %s633_s17 = scalar_lea.vmem %s439_s2, 1024  ;;  %p638_p1 = scmp.lt.s32.totalorder %s439_s2, %s439_s2 }
  0x22   :  { %257 = vmatpush1.bf16.msra.mxu0 %v604_v11  ;;  %587 = vmatpush1.bf16.msra.mxu1 %v604_v11  ;;  %p634_p0 = scmp.ne.s32.totalorder %s439_s2, %s633_s17  ;;  %p639_p2 = scmp.lt.s32.totalorder %s633_s17, %s633_s17 }
  0x23   :  { %258 = vmatprep.subr.bf16.mxu0 %v657_v1  ;;  %575 = vmatprep.subr.bf16.mxu1 %v657_v1 }
  0x24   :  { %p640_p3 = por %p639_p2, %p638_p1 }
  0x26   :  { %259 = vmatpush1.bf16.msra.mxu0 %v605_v12  ;;  %588 = vmatpush1.bf16.msra.mxu1 %v605_v12  ;;  %p641_p4 = pnand %p640_p3, %p634_p0 }
  0x27   :  { %260 = vmatprep.subr.bf16.mxu0 %v657_v1  ;;  %576 = vmatprep.subr.bf16.mxu1 %v657_v1 }
  0x2a   :  { %261 = vmatpush1.bf16.msra.mxu0 %v606_v13  ;;  %589 = vmatpush1.bf16.msra.mxu1 %v606_v13 }
  0x2b   :  { %262 = vmatprep.subr.bf16.mxu0 %v657_v1  ;;  %577 = vmatprep.subr.bf16.mxu1 %v657_v1 }
  0x2e   :  { %263 = vmatpush1.bf16.msra.mxu0 %v607_v14  ;;  %590 = vmatpush1.bf16.msra.mxu1 %v607_v14 }
  0x2f   :  { %264 = vmatprep.subr.bf16.mxu0 %v657_v1  ;;  %578 = vmatprep.subr.bf16.mxu1 %v657_v1 }
  0x32   :  { %265 = vmatpush1.bf16.msra.mxu0 %v238_v16  ;;  %591 = vmatpush1.bf16.msra.mxu1 %v238_v16 }
  0x35   :  { %273 = vmatmul.mubr.bf16.vlgmr.msra.gmra.mrb[0].mxu0 %v609_v17  ;;  %305 = vmatmul.mubr.bf16.vlgmr.msra.gmra.mrb[0].mxu1 %v612_v18 }
  0x36   :  { %480 = vmatprep.mubr.msk.bf16.mxu0 %vm211_vm0, %v615_v19  ;;  %484 = vmatprep.mubr.msk.bf16.mxu1 %vm211_vm0, %v617_v20 }
  0x3d   :  { %281 = vmatmul.mubr.bf16.gmra.mrb[4].mxu0 %v619_v21  ;;  %313 = vmatmul.mubr.bf16.gmra.mrb[4].mxu1 %v620_v22 }
  0x3e   :  { %481 = vmatprep.mubr.msk.bf16.mxu0 %vm211_vm0, %v621_v23  ;;  %485 = vmatprep.mubr.msk.bf16.mxu1 %vm211_vm0, %v623_v24 }
  0x45   :  { %289 = vmatmul.mubr.bf16.gmra.mrb[8].mxu0 %v625_v25  ;;  %321 = vmatmul.mubr.bf16.gmra.mrb[8].mxu1 %v626_v26 }
  0x46   :  { %482 = vmatprep.mubr.msk.bf16.mxu0 %vm211_vm0, %v627_v27  ;;  %486 = vmatprep.mubr.msk.bf16.mxu1 %vm211_vm0, %v629_v28 }
  0x4d   :  { %297 = vmatmul.mubr.bf16.gmra.mrb[12].mxu0 %v631_v29  ;;  %329 = vmatmul.mubr.bf16.gmra.mrb[12].mxu1 %v632_v30 }
 0x108   :  { %v274_v32 = vpop.f32.mrb[0].mxu0  ;;  %v306_v33 = vpop.f32.mrb[0].mxu1 }
 0x109   :  { %v275_v34 = vadd.f32 %v805_v31, %v274_v32  ;;  %v307_v35 = vadd.f32 %v805_v31, %v306_v33  ;;  %v276_v36 = vpop.f32.mrb[1].mxu0  ;;  %v308_v37 = vpop.f32.mrb[1].mxu1 }
 0x10a   :  { %v277_v38 = vpop.f32.mrb[2].mxu0  ;;  %v309_v39 = vpop.f32.mrb[2].mxu1 }
 0x10b   :  { %v278_v40 = vadd.f32 %v805_v31, %v277_v38  ;;  %v310_v41 = vadd.f32 %v805_v31, %v309_v39  ;;  %v279_v42 = vpop.f32.mrb[3].mxu0  ;;  %v311_v43 = vpop.f32.mrb[3].mxu1  ;;  %v337_v44 = vmax.f32 %v275_v34, 0.0  ;;  %v345_v45 = vmax.f32 %v307_v35, 0.0 }
 0x10d   :  { %v338_v46 = vmax.f32 %v278_v40, 0.0  ;;  %v346_v47 = vmax.f32 %v310_v41, 0.0 }
 0x10f   :  { %v522_v48 = vpack.c.bf16 %v338_v46, %v337_v44  ;;  %v542_v49 = vpack.c.bf16 %v346_v47, %v345_v45 }
 0x110   :  { %v282_v50 = vpop.f32.mrb[4].mxu0  ;;  %v314_v51 = vpop.f32.mrb[4].mxu1 }
 0x111   :  { %523 = vst [vmem:[#allocation2] sm:$0xff] %v522_v48   ;;  %562 = vst [vmem:[#allocation2 + $0x20] sm:$0xff] %v542_v49   ;;  %v283_v52 = vadd.f32 %v805_v31, %v282_v50  ;;  %v315_v53 = vadd.f32 %v805_v31, %v314_v51  ;;  %v284_v54 = vpop.f32.mrb[5].mxu0  ;;  %v316_v55 = vpop.f32.mrb[5].mxu1 }
 0x112   :  { %v285_v56 = vpop.f32.mrb[6].mxu0  ;;  %v317_v57 = vpop.f32.mrb[6].mxu1 }
 0x113   :  { %v286_v58 = vadd.f32 %v805_v31, %v285_v56  ;;  %v318_v59 = vadd.f32 %v805_v31, %v317_v57  ;;  %v287_v60 = vpop.f32.mrb[7].mxu0  ;;  %v319_v61 = vpop.f32.mrb[7].mxu1  ;;  %v339_v62 = vmax.f32 %v283_v52, 0.0  ;;  %v347_v63 = vmax.f32 %v315_v53, 0.0 }
 0x115   :  { %v340_v0 = vmax.f32 %v286_v58, 0.0  ;;  %v348_v1 = vmax.f32 %v318_v59, 0.0 }
 0x117   :  { %v527_v2 = vpack.c.bf16 %v340_v0, %v339_v62  ;;  %v547_v3 = vpack.c.bf16 %v348_v1, %v347_v63 }
 0x118   :  { %v290_v4 = vpop.f32.mrb[8].mxu0  ;;  %v322_v5 = vpop.f32.mrb[8].mxu1 }
 0x119   :  { %559 = vst [vmem:[#allocation2 + $0x8] sm:$0xff] %v527_v2   ;;  %563 = vst [vmem:[#allocation2 + $0x28] sm:$0xff] %v547_v3   ;;  %v291_v6 = vadd.f32 %v805_v31, %v290_v4  ;;  %v323_v7 = vadd.f32 %v805_v31, %v322_v5  ;;  %v292_v8 = vpop.f32.mrb[9].mxu0  ;;  %v324_v9 = vpop.f32.mrb[9].mxu1 }
 0x11a   :  { %v293_v10 = vpop.f32.mrb[10].mxu0  ;;  %v325_v11 = vpop.f32.mrb[10].mxu1 }
 0x11b   :  { %v294_v12 = vadd.f32 %v805_v31, %v293_v10  ;;  %v326_v13 = vadd.f32 %v805_v31, %v325_v11  ;;  %v295_v14 = vpop.f32.mrb[11].mxu0  ;;  %v327_v15 = vpop.f32.mrb[11].mxu1  ;;  %v341_v16 = vmax.f32 %v291_v6, 0.0  ;;  %v349_v17 = vmax.f32 %v323_v7, 0.0 }
 0x11d   :  { %v342_v18 = vmax.f32 %v294_v12, 0.0  ;;  %v350_v19 = vmax.f32 %v326_v13, 0.0 }
 0x11f   :  { %v532_v20 = vpack.c.bf16 %v342_v18, %v341_v16  ;;  %v552_v21 = vpack.c.bf16 %v350_v19, %v349_v17 }
 0x120   :  { %v298_v22 = vpop.f32.mrb[12].mxu0  ;;  %v330_v23 = vpop.f32.mrb[12].mxu1 }
 0x121   :  { %560 = vst [vmem:[#allocation2 + $0x10] sm:$0xff] %v532_v20   ;;  %564 = vst [vmem:[#allocation2 + $0x30] sm:$0xff] %v552_v21   ;;  %v299_v24 = vadd.f32 %v805_v31, %v298_v22  ;;  %v331_v25 = vadd.f32 %v805_v31, %v330_v23  ;;  %v300_v26 = vpop.f32.mrb[13].mxu0  ;;  %v332_v27 = vpop.f32.mrb[13].mxu1 }
 0x122   :  { %v301_v28 = vpop.f32.mrb[14].mxu0  ;;  %v333_v29 = vpop.f32.mrb[14].mxu1 }
 0x123   :  { %v302_v30 = vadd.f32 %v805_v31, %v301_v28  ;;  %v334_v32 = vadd.f32 %v805_v31, %v333_v29  ;;  %v303_v33 = vpop.f32.mrb[15].mxu0  ;;  %v335_v34 = vpop.f32.mrb[15].mxu1  ;;  %v343_v35 = vmax.f32 %v299_v24, 0.0  ;;  %v351_v36 = vmax.f32 %v331_v25, 0.0 }
 0x125   :  { %v344_v37 = vmax.f32 %v302_v30, 0.0  ;;  %v352_v38 = vmax.f32 %v334_v32, 0.0 }
 0x127   :  { %v537_v39 = vpack.c.bf16 %v344_v37, %v343_v35  ;;  %v557_v40 = vpack.c.bf16 %v352_v38, %v351_v36 }
 0x129   :  { %561 = vst [vmem:[#allocation2 + $0x18] sm:$0xff] %v537_v39   ;;  %565 = vst [vmem:[#allocation2 + $0x38] sm:$0xff] %v557_v40  }
 0x12a   :  { %644 = shalt.err (!%p641_p4)
}
 0x12b   :  { %s645_s1 = scalar_lea.hbm %s838_s3, 1024 }
 0x12c   :  { %p646_p5 = scmp.ne.s32.totalorder %s838_s3, %s645_s1  ;;  %p649_p6 = scmp.lt.u32.totalorder %s645_s1, %s838_s3 }
 0x12e   :  { %p651_p7 = pnand %p649_p6, %p646_p5 }
 0x130   :  { %654 = shalt.err (!%p651_p7)
}
 0x131   :  { %s659_s24 = smov 64   ;;  %s660_s25 = smov 4  }
 0x132   :  { %444 = dma.vmem_to_hbm [thread:$0]  %s439_s2, 1024, %s838_s3, [#allocation3], %s659_s24, %s659_s24, %s660_s25  }
 0x133   :  { %655 = dma.done.wait [#allocation3], 1024  }
 0x134   :  { %656 = vsyncadd [#allocation3], 4294966272 }
 0x135   :  { %448 = vsyncpa [#allocation3], 1 }

</bundles_post_ra>
